<compile_context>
chip_gen: v6e
topology: v6e:2x2x1
jax: 0.10.0
libtpu: 0.0.40
codegen_flags: <defaults>
</compile_context>

<pallas_src>
import functools

import jax
import jax.numpy as jnp
from jax import lax
from jax.experimental import pallas as pl
from jax.experimental.pallas import tpu as pltpu


def _round_up(n, m):
    return ((n + m - 1) // m) * m


def _siae_kernel(x_ref, we_ref, be_ref, wd_ref, bd_ref,
                 o_ref, z_ref, l2_ref, *, nk):
    """Two-phase (encode-accumulate then decode) kernel, Dp-tiled.

    Grid axis 1 has 2*nk steps; k < nk is the encode phase, k >= nk decode.

    x_ref : (TB, TD)  flattened-input tile (f32 or bf16)
    we_ref: (TD, Hp)  encoder weight tile (f32 or bf16)
    be_ref: (1,  Hp)  encoder bias (f32, resident)
    wd_ref: (Hp, TD)  decoder weight tile (f32 or bf16)
    bd_ref: (1,  TD)  decoder bias tile (f32)
    o_ref : (TB, TD)  reconstructed-image tile
    z_ref : (TB, Hp)  bottleneck features (VMEM-resident accumulator)
    l2_ref: (TB, 1)   L2 norm (VMEM-resident accumulator; holds sumsq first)
    """
    k = pl.program_id(1)

    @pl.when(k == 0)
    def _init():
        z_ref[...] = jnp.zeros_like(z_ref)
        l2_ref[...] = jnp.zeros_like(l2_ref)

    @pl.when(k < nk)
    def _encode_accumulate():
        x = x_ref[...]                                        # (TB, TD)
        xf = x.astype(jnp.float32)
        l2_ref[...] += jnp.sum(xf * xf, axis=1, keepdims=True)
        # L2 scaling is folded through the matmul: (x/l2) @ We == (x @ We)/l2
        z_ref[...] += jnp.dot(x.astype(we_ref.dtype), we_ref[...],
                              preferred_element_type=jnp.float32)

    @pl.when(k == nk - 1)
    def _encode_finalize():
        sumsq = l2_ref[...]                                   # (TB, 1)
        inv_l2 = lax.rsqrt(sumsq + jnp.float32(1e-24))        # EUP rsqrt
        z_ref[...] = jnp.tanh(z_ref[...] * inv_l2 + be_ref[...])
        l2_ref[...] = sumsq * inv_l2                          # == sqrt(sumsq)

    @pl.when(k >= nk)
    def _decode():
        z = z_ref[...]                                        # (TB, Hp) f32
        y = (jnp.dot(z.astype(wd_ref.dtype), wd_ref[...],
                     preferred_element_type=jnp.float32)
             + bd_ref[...]) * l2_ref[...]                     # (TB, TD)
        o_ref[...] = y.astype(o_ref.dtype)


def siae_forward(imgs, w_enc, b_enc, w_dec, b_dec, *,
                 block_b=128, block_d=2048,
                 matmul_dtype=jnp.bfloat16,
                 stream_dtype=None,
                 out_dtype=jnp.float32):
    """imgs: (B, 1, H, W) -> (recon (B,1,H,W), z (B,Hb), l2 (B,1)).

    matmul_dtype : dtype of the MXU operands (weights / matmul inputs);
                   elementwise math stays f32.
    stream_dtype : dtype x is streamed through HBM in (None -> float32).
    out_dtype    : dtype of the reconstructed-image stream.
    """
    B, C, H, W = imgs.shape
    assert C == 1, "channel dim is fixed to 1 by the module contract"
    D = H * W
    Hb = w_enc.shape[1]

    # Lane-dense / MXU-friendly padded sizes and tiles.
    Hp = _round_up(Hb, 128)
    Dp0 = _round_up(D, 128)
    TD = min(_round_up(block_d, 128), Dp0)      # Dp tile, multiple of 128
    Dp = _round_up(Dp0, TD)
    nk = Dp // TD

    Bp8 = _round_up(B, 8)
    TB = min(block_b, Bp8)                      # batch tile, multiple of 8
    if Bp8 <= TB and Bp8 >= 16:
        # Split into >=2 batch-grid steps so both v7x TensorCores get work.
        TB = _round_up((Bp8 + 1) // 2, 8)
    Bp = _round_up(Bp8, TB)

    x_dtype = jnp.dtype(stream_dtype) if stream_dtype is not None else jnp.dtype(jnp.float32)

    # Flatten; pad only when needed (pad/slice are extra HBM passes).
    x = imgs.reshape(B, D)
    if x.dtype != x_dtype:
        x = x.astype(x_dtype)
    if (Bp - B) or (Dp - D):
        x = jnp.pad(x, ((0, Bp - B), (0, Dp - D)))

    we = w_enc.astype(matmul_dtype)
    wd = w_dec.astype(matmul_dtype)
    be = b_enc.astype(jnp.float32).reshape(1, Hb)
    bd = b_dec.astype(jnp.float32).reshape(1, D)
    if (Dp - D) or (Hp - Hb):
        we = jnp.pad(we, ((0, Dp - D), (0, Hp - Hb)))
        wd = jnp.pad(wd, ((0, Hp - Hb), (0, Dp - D)))
        be = jnp.pad(be, ((0, 0), (0, Hp - Hb)))
        bd = jnp.pad(bd, ((0, 0), (0, Dp - D)))

    kmax = nk - 1
    grid = (Bp // TB, 2 * nk)

    # VMEM budget from the double-buffered working set (+ headroom).
    def _bytes(n, dt):
        return n * jnp.dtype(dt).itemsize
    working = (2 * _bytes(TB * TD, x_dtype)        # x tiles
               + 2 * _bytes(TD * Hp, matmul_dtype)  # encoder weight tiles
               + 2 * _bytes(Hp * TD, matmul_dtype)  # decoder weight tiles
               + 2 * _bytes(Hp, jnp.float32)        # encoder bias
               + 2 * _bytes(TD, jnp.float32)        # decoder bias tiles
               + 2 * _bytes(TB * TD, out_dtype)     # output tiles
               + 2 * _bytes(TB * Hp, jnp.float32)   # bottleneck (resident)
               + 2 * _bytes(TB, jnp.float32))       # l2 (resident)
    vmem_limit = int(min(128 * 1024 * 1024, 2 * working + (8 << 20)))

    out_flat, z, l2 = pl.pallas_call(
        functools.partial(_siae_kernel, nk=nk),
        out_shape=(
            jax.ShapeDtypeStruct((Bp, Dp), out_dtype),
            jax.ShapeDtypeStruct((Bp, Hp), jnp.float32),
            jax.ShapeDtypeStruct((Bp, 1), jnp.float32),
        ),
        grid=grid,
        in_specs=[
            # x: steps through Dp tiles in the encode phase, pinned afterwards.
            pl.BlockSpec((TB, TD), lambda i, k: (i, jnp.minimum(k, kmax))),
            # encoder weight: tiled along Dp in the encode phase.
            pl.BlockSpec((TD, Hp), lambda i, k: (jnp.minimum(k, kmax), 0)),
            # encoder bias: resident.
            pl.BlockSpec((1, Hp), lambda i, k: (0, 0)),
            # decoder weight / bias: pinned during encode, tiled during decode.
            pl.BlockSpec((Hp, TD), lambda i, k: (0, jnp.maximum(k - nk, 0))),
            pl.BlockSpec((1, TD), lambda i, k: (0, jnp.maximum(k - nk, 0))),
        ],
        out_specs=(
            pl.BlockSpec((TB, TD), lambda i, k: (i, jnp.maximum(k - nk, 0))),
            pl.BlockSpec((TB, Hp), lambda i, k: (i, 0)),   # resident accumulator
            pl.BlockSpec((TB, 1), lambda i, k: (i, 0)),    # resident accumulator
        ),
        compiler_params=pltpu.CompilerParams(
            dimension_semantics=("parallel", "arbitrary"),
            vmem_limit_bytes=vmem_limit,
        ),
    )(x, we, be, wd, bd)

    out = out_flat
    if (Bp != B) or (Dp != D):
        out = out[:B, :D]
    recon = out.reshape(B, 1, H, W)
    z_out = z[:B, :Hb] if (Bp != B or Hp != Hb) else z
    l2_out = l2[:B] if Bp != B else l2
    return recon, z_out, l2_out


def _reference(imgs, w_enc, b_enc, w_dec, b_dec):
    B = imgs.shape[0]
    x = imgs.reshape(B, -1).astype(jnp.float32)
    l2 = jnp.sqrt(jnp.sum(x * x, axis=1, keepdims=True))
    xn = x / (l2 + 1e-12)
    z = jnp.tanh(xn @ w_enc + b_enc)
    y = (z @ w_dec + b_dec) * l2
    return y.reshape(imgs.shape), z, l2


def _make_case(key, B, Himg, Wimg, bottleneck):
    D = Himg * Wimg
    k_img, k_we, k_be, k_wd, k_bd = jax.random.split(key, 5)
    imgs = jax.random.uniform(k_img, (B, 1, Himg, Wimg), dtype=jnp.float32)
    w_enc = 0.05 * jax.random.normal(k_we, (D, bottleneck), dtype=jnp.float32)
    b_enc = 0.01 * jax.random.normal(k_be, (bottleneck,), dtype=jnp.float32)
    w_dec = 0.05 * jax.random.normal(k_wd, (bottleneck, D), dtype=jnp.float32)
    b_dec = 0.01 * jax.random.normal(k_bd, (D,), dtype=jnp.float32)
    return imgs, w_enc, b_enc, w_dec, b_dec


if __name__ == "__main__":
    key = jax.random.PRNGKey(0)
    k1, k2 = jax.random.split(key)

    # ---- Case 1: small aligned shapes (B=2, 1x16x16, bottleneck=32) ----
    imgs, w_enc, b_enc, w_dec, b_dec = _make_case(k1, 2, 16, 16, 32)
    ref_recon, ref_z, ref_l2 = _reference(imgs, w_enc, b_enc, w_dec, b_dec)

    # f32 MXU operands (tight tolerance, v5e-safe elementwise path anyway).
    recon, z, l2 = siae_forward(imgs, w_enc, b_enc, w_dec, b_dec,
                                matmul_dtype=jnp.float32)
    recon = jax.block_until_ready(recon)
    assert recon.shape == (2, 1, 16, 16)
    assert z.shape == (2, 32)
    assert l2.shape == (2, 1)
    assert jnp.allclose(l2, ref_l2, atol=1e-5, rtol=1e-5)
    assert jnp.allclose(z, ref_z, atol=1e-4, rtol=1e-4)
    assert jnp.allclose(recon, ref_recon, atol=1e-4, rtol=1e-4)

    # Default bf16 MXU operands + bf16 x streaming (looser tolerances; f32 accum).
    recon_bf, z_bf, l2_bf = siae_forward(imgs, w_enc, b_enc, w_dec, b_dec,
                                         matmul_dtype=jnp.bfloat16,
                                         stream_dtype=jnp.bfloat16)
    recon_bf = jax.block_until_ready(recon_bf)
    assert jnp.allclose(l2_bf, ref_l2, atol=1e-2, rtol=1e-2)
    assert jnp.allclose(z_bf, ref_z, atol=1e-2, rtol=5e-2)
    assert jnp.allclose(recon_bf, ref_recon, atol=2e-2, rtol=5e-2)

    # ---- Case 2: ragged shapes exercising Dp tiling + batch split + padding ----
    # B=20 (-> two batch tiles of 16), 24x20 image (D=480 -> Dp=512, 2 Dp tiles
    # with block_d=256), bottleneck=48.
    imgs2, w_enc2, b_enc2, w_dec2, b_dec2 = _make_case(k2, 20, 24, 20, 48)
    ref_recon2, ref_z2, ref_l22 = _reference(imgs2, w_enc2, b_enc2, w_dec2, b_dec2)

    recon2, z2, l22 = siae_forward(imgs2, w_enc2, b_enc2, w_dec2, b_dec2,
                                   block_d=256, matmul_dtype=jnp.float32)
    recon2 = jax.block_until_ready(recon2)
    assert recon2.shape == (20, 1, 24, 20)
    assert z2.shape == (20, 48)
    assert l22.shape == (20, 1)
    assert jnp.allclose(l22, ref_l22, atol=1e-4, rtol=1e-5)
    assert jnp.allclose(z2, ref_z2, atol=1e-4, rtol=1e-4)
    assert jnp.allclose(recon2, ref_recon2, atol=1e-4, rtol=1e-4)

    recon2b, z2b, l22b = siae_forward(imgs2, w_enc2, b_enc2, w_dec2, b_dec2,
                                      block_d=256, matmul_dtype=jnp.bfloat16)
    recon2b = jax.block_until_ready(recon2b)
    assert jnp.allclose(l22b, ref_l22, atol=1e-4, rtol=1e-4)
    assert jnp.allclose(z2b, ref_z2, atol=1e-2, rtol=5e-2)
    assert jnp.allclose(recon2b, ref_recon2, atol=2e-2, rtol=5e-2)

    print("KERNEL_OK")
</pallas_src>

<mosaic_0001>
module attributes {stable_mosaic.version = 11 : i64} {
  func.func @_siae_kernel(%arg0: i32, %arg1: i32, %arg2: memref<8x256xf32, #tpu.memory_space<vmem>>, %arg3: memref<256x128xf32, #tpu.memory_space<vmem>>, %arg4: memref<1x128xf32, #tpu.memory_space<vmem>>, %arg5: memref<128x256xf32, #tpu.memory_space<vmem>>, %arg6: memref<1x256xf32, #tpu.memory_space<vmem>>, %arg7: memref<8x256xf32, #tpu.memory_space<vmem>>, %arg8: memref<8x128xf32, #tpu.memory_space<vmem>>, %arg9: memref<8x1xf32, #tpu.memory_space<vmem>>) attributes {dimension_semantics = [#tpu.dimension_semantics<parallel>, #tpu.dimension_semantics<arbitrary>], iteration_bounds = array<i64: 1, 2>, scalar_prefetch = 0 : i64, scratch_operands = 0 : i64, tpu.core_type = #tpu.core_type<tc>, window_params = [{transform_indices = @transform_0, window_bounds = array<i64: 8, 256>}, {transform_indices = @transform_1, window_bounds = array<i64: 256, 128>}, {pipeline_mode = #tpu.pipeline_mode<synchronous>, transform_indices = @transform_2, window_bounds = array<i64: 1, 128>}, {transform_indices = @transform_3, window_bounds = array<i64: 128, 256>}, {transform_indices = @transform_4, window_bounds = array<i64: 1, 256>}, {transform_indices = @transform_5, window_bounds = array<i64: 8, 256>}, {transform_indices = @transform_6, window_bounds = array<i64: 8, 128>}, {transform_indices = @transform_7, window_bounds = array<i64: 8, 1>}]} {
    %c0_i32 = arith.constant 0 : i32
    %0 = arith.cmpi eq, %arg1, %c0_i32 : i32
    %1 = arith.extui %0 : i1 to i32
    %c0_i32_0 = arith.constant 0 : i32
    %2 = arith.cmpi ne, %1, %c0_i32_0 : i32
    scf.if %2 {
      %cst = arith.constant 0.000000e+00 : f32
      %12 = vector.broadcast %cst : f32 to vector<8x128xf32>
      %c0 = arith.constant 0 : index
      %c0_6 = arith.constant 0 : index
      %13 = vector.load %arg8[%c0, %c0_6] : memref<8x128xf32, #tpu.memory_space<vmem>>, vector<8x128xf32>
      tpu.vector_store %arg8[%c0, %c0_6], %12 {strides = array<i32>} : memref<8x128xf32, #tpu.memory_space<vmem>>, vector<8x128xf32>,
      %cst_7 = arith.constant 0.000000e+00 : f32
      %14 = vector.broadcast %cst_7 : f32 to vector<8x1xf32>
      %c0_8 = arith.constant 0 : index
      %c0_9 = arith.constant 0 : index
      %15 = vector.load %arg9[%c0_8, %c0_9] : memref<8x1xf32, #tpu.memory_space<vmem>>, vector<8x1xf32>
      tpu.vector_store %arg9[%c0_8, %c0_9], %14 {strides = array<i32>} : memref<8x1xf32, #tpu.memory_space<vmem>>, vector<8x1xf32>,
    } else {
    }
    %c1_i32 = arith.constant 1 : i32
    %3 = arith.cmpi slt, %arg1, %c1_i32 : i32
    %4 = arith.extui %3 : i1 to i32
    %c0_i32_1 = arith.constant 0 : i32
    %5 = arith.cmpi ne, %4, %c0_i32_1 : i32
    scf.if %5 {
      %c0 = arith.constant 0 : index
      %c0_6 = arith.constant 0 : index
      %12 = vector.load %arg2[%c0, %c0_6] : memref<8x256xf32, #tpu.memory_space<vmem>>, vector<8x256xf32>
      %c0_7 = arith.constant 0 : index
      %c0_8 = arith.constant 0 : index
      %13 = vector.load %arg9[%c0_7, %c0_8] : memref<8x1xf32, #tpu.memory_space<vmem>>, vector<8x1xf32>
      %14 = arith.mulf %12, %12 : vector<8x256xf32>
      %cst = arith.constant dense<0.000000e+00> : vector<8xf32>
      %15 = vector.multi_reduction <add>, %14, %cst [1] : vector<8x256xf32> to vector<8xf32>
      %16 = vector.shape_cast %15 : vector<8xf32> to vector<8x1xf32>
      %17 = arith.addf %13, %16 : vector<8x1xf32>
      %c0_9 = arith.constant 0 : index
      %c0_10 = arith.constant 0 : index
      %18 = vector.load %arg9[%c0_9, %c0_10] : memref<8x1xf32, #tpu.memory_space<vmem>>, vector<8x1xf32>
      tpu.vector_store %arg9[%c0_9, %c0_10], %17 {strides = array<i32>} : memref<8x1xf32, #tpu.memory_space<vmem>>, vector<8x1xf32>,
      %c0_11 = arith.constant 0 : index
      %c0_12 = arith.constant 0 : index
      %19 = vector.load %arg8[%c0_11, %c0_12] : memref<8x128xf32, #tpu.memory_space<vmem>>, vector<8x128xf32>
      %c0_13 = arith.constant 0 : index
      %c0_14 = arith.constant 0 : index
      %20 = vector.load %arg3[%c0_13, %c0_14] : memref<256x128xf32, #tpu.memory_space<vmem>>, vector<256x128xf32>
      %cst_15 = arith.constant dense<0.000000e+00> : vector<8x128xf32>
      %21 = tpu.matmul %12, %20, %cst_15 {dimension_numbers = #tpu.dot_dimension_numbers<[1], [0], [0], [1], [0, 0, 1, 1], [], []>} : vector<8x256xf32>, vector<256x128xf32>, vector<8x128xf32> -> vector<8x128xf32>
      %22 = arith.addf %19, %21 : vector<8x128xf32>
      %c0_16 = arith.constant 0 : index
      %c0_17 = arith.constant 0 : index
      %23 = vector.load %arg8[%c0_16, %c0_17] : memref<8x128xf32, #tpu.memory_space<vmem>>, vector<8x128xf32>
      tpu.vector_store %arg8[%c0_16, %c0_17], %22 {strides = array<i32>} : memref<8x128xf32, #tpu.memory_space<vmem>>, vector<8x128xf32>,
    } else {
    }
    %c0_i32_2 = arith.constant 0 : i32
    %6 = arith.cmpi eq, %arg1, %c0_i32_2 : i32
    %7 = arith.extui %6 : i1 to i32
    %c0_i32_3 = arith.constant 0 : i32
    %8 = arith.cmpi ne, %7, %c0_i32_3 : i32
    scf.if %8 {
      %c0 = arith.constant 0 : index
      %c0_6 = arith.constant 0 : index
      %12 = vector.load %arg9[%c0, %c0_6] : memref<8x1xf32, #tpu.memory_space<vmem>>, vector<8x1xf32>
      %cst = arith.constant 1.000000e-24 : f32
      %13 = vector.broadcast %cst : f32 to vector<8x1xf32>
      %14 = arith.addf %12, %13 : vector<8x1xf32>
      %15 = math.rsqrt %14 : vector<8x1xf32>
      %c0_7 = arith.constant 0 : index
      %c0_8 = arith.constant 0 : index
      %16 = vector.load %arg8[%c0_7, %c0_8] : memref<8x128xf32, #tpu.memory_space<vmem>>, vector<8x128xf32>
      %17 = vector.broadcast %15 : vector<8x1xf32> to vector<8x128xf32>
      %18 = arith.mulf %16, %17 : vector<8x128xf32>
      %c0_9 = arith.constant 0 : index
      %c0_10 = arith.constant 0 : index
      %19 = vector.load %arg4[%c0_9, %c0_10] : memref<1x128xf32, #tpu.memory_space<vmem>>, vector<1x128xf32>
      %20 = vector.broadcast %19 : vector<1x128xf32> to vector<8x128xf32>
      %21 = arith.addf %18, %20 : vector<8x128xf32>
      %22 = math.tanh %21 : vector<8x128xf32>
      %c0_11 = arith.constant 0 : index
      %c0_12 = arith.constant 0 : index
      %23 = vector.load %arg8[%c0_11, %c0_12] : memref<8x128xf32, #tpu.memory_space<vmem>>, vector<8x128xf32>
      tpu.vector_store %arg8[%c0_11, %c0_12], %22 {strides = array<i32>} : memref<8x128xf32, #tpu.memory_space<vmem>>, vector<8x128xf32>,
      %24 = arith.mulf %12, %15 : vector<8x1xf32>
      %c0_13 = arith.constant 0 : index
      %c0_14 = arith.constant 0 : index
      %25 = vector.load %arg9[%c0_13, %c0_14] : memref<8x1xf32, #tpu.memory_space<vmem>>, vector<8x1xf32>
      tpu.vector_store %arg9[%c0_13, %c0_14], %24 {strides = array<i32>} : memref<8x1xf32, #tpu.memory_space<vmem>>, vector<8x1xf32>,
    } else {
    }
    %c1_i32_4 = arith.constant 1 : i32
    %9 = arith.cmpi sge, %arg1, %c1_i32_4 : i32
    %10 = arith.extui %9 : i1 to i32
    %c0_i32_5 = arith.constant 0 : i32
    %11 = arith.cmpi ne, %10, %c0_i32_5 : i32
    scf.if %11 {
      %c0 = arith.constant 0 : index
      %c0_6 = arith.constant 0 : index
      %12 = vector.load %arg8[%c0, %c0_6] : memref<8x128xf32, #tpu.memory_space<vmem>>, vector<8x128xf32>
      %c0_7 = arith.constant 0 : index
      %c0_8 = arith.constant 0 : index
      %13 = vector.load %arg5[%c0_7, %c0_8] : memref<128x256xf32, #tpu.memory_space<vmem>>, vector<128x256xf32>
      %cst = arith.constant dense<0.000000e+00> : vector<8x256xf32>
      %14 = tpu.matmul %12, %13, %cst {dimension_numbers = #tpu.dot_dimension_numbers<[1], [0], [0], [1], [0, 0, 1, 1], [], []>} : vector<8x128xf32>, vector<128x256xf32>, vector<8x256xf32> -> vector<8x256xf32>
      %c0_9 = arith.constant 0 : index
      %c0_10 = arith.constant 0 : index
      %15 = vector.load %arg6[%c0_9, %c0_10] : memref<1x256xf32, #tpu.memory_space<vmem>>, vector<1x256xf32>
      %16 = vector.broadcast %15 : vector<1x256xf32> to vector<8x256xf32>
      %17 = arith.addf %14, %16 : vector<8x256xf32>
      %c0_11 = arith.constant 0 : index
      %c0_12 = arith.constant 0 : index
      %18 = vector.load %arg9[%c0_11, %c0_12] : memref<8x1xf32, #tpu.memory_space<vmem>>, vector<8x1xf32>
      %19 = vector.broadcast %18 : vector<8x1xf32> to vector<8x256xf32>
      %20 = arith.mulf %17, %19 : vector<8x256xf32>
      %c0_13 = arith.constant 0 : index
      %c0_14 = arith.constant 0 : index
      %21 = vector.load %arg7[%c0_13, %c0_14] : memref<8x256xf32, #tpu.memory_space<vmem>>, vector<8x256xf32>
      tpu.vector_store %arg7[%c0_13, %c0_14], %20 {strides = array<i32>} : memref<8x256xf32, #tpu.memory_space<vmem>>, vector<8x256xf32>,
    } else {
    }
    return
  }
  func.func @transform_0(%arg0: i32, %arg1: i32) -> (i32, i32) {
    %c0_i32 = arith.constant 0 : i32
    %0 = arith.minsi %arg1, %c0_i32 : i32
    %c0_i32_0 = arith.constant 0 : i32
    return %arg0, %0 : i32, i32
  }
  func.func @transform_1(%arg0: i32, %arg1: i32) -> (i32, i32) {
    %c0_i32 = arith.constant 0 : i32
    %0 = arith.minsi %arg1, %c0_i32 : i32
    %c0_i32_0 = arith.constant 0 : i32
    %c0_i32_1 = arith.constant 0 : i32
    return %0, %c0_i32_0 : i32, i32
  }
  func.func @transform_2(%arg0: i32, %arg1: i32) -> (i32, i32) {
    %c0_i32 = arith.constant 0 : i32
    %c0_i32_0 = arith.constant 0 : i32
    %c0_i32_1 = arith.constant 0 : i32
    return %c0_i32, %c0_i32_0 : i32, i32
  }
  func.func @transform_3(%arg0: i32, %arg1: i32) -> (i32, i32) {
    %c1_i32 = arith.constant 1 : i32
    %0 = arith.subi %arg1, %c1_i32 : i32
    %c0_i32 = arith.constant 0 : i32
    %1 = arith.maxsi %0, %c0_i32 : i32
    %c0_i32_0 = arith.constant 0 : i32
    %c0_i32_1 = arith.constant 0 : i32
    return %c0_i32_0, %1 : i32, i32
  }
  func.func @transform_4(%arg0: i32, %arg1: i32) -> (i32, i32) {
    %c1_i32 = arith.constant 1 : i32
    %0 = arith.subi %arg1, %c1_i32 : i32
    %c0_i32 = arith.constant 0 : i32
    %1 = arith.maxsi %0, %c0_i32 : i32
    %c0_i32_0 = arith.constant 0 : i32
    %c0_i32_1 = arith.constant 0 : i32
    return %c0_i32_0, %1 : i32, i32
  }
  func.func @transform_5(%arg0: i32, %arg1: i32) -> (i32, i32) {
    %c1_i32 = arith.constant 1 : i32
    %0 = arith.subi %arg1, %c1_i32 : i32
    %c0_i32 = arith.constant 0 : i32
    %1 = arith.maxsi %0, %c0_i32 : i32
    %c0_i32_0 = arith.constant 0 : i32
    return %arg0, %1 : i32, i32
  }
  func.func @transform_6(%arg0: i32, %arg1: i32) -> (i32, i32) {
    %c0_i32 = arith.constant 0 : i32
    %c0_i32_0 = arith.constant 0 : i32
    return %arg0, %c0_i32 : i32, i32
  }
  func.func @transform_7(%arg0: i32, %arg1: i32) -> (i32, i32) {
    %c0_i32 = arith.constant 0 : i32
    %c0_i32_0 = arith.constant 0 : i32
    return %arg0, %c0_i32 : i32, i32
  }
}

</mosaic_0001>

<bundles_post_ra>
// kernel: tpu_custom_call.1
= control target key start
LH: loop header
LB: loop body
LE: loop exit
PB: predicated region body
PF: predicated region fallthrough
CT: control target
= control target key end

     0   :  { %13 = vsyncpa [#allocation3], 0  ;;  %s1785_s0 = inlined_call_operand.hbm [shape: f32[8,256], index: 0, kind: input, shape index: {}]   ;;  %s1786_s1 = inlined_call_operand.hbm [shape: f32[256,128], index: 1, kind: input, shape index: {}]   ;;  %s1787_s2 = inlined_call_operand.vmem [shape: f32[1,128], index: 2, kind: input, shape index: {}]   ;;  %s1788_s3 = inlined_call_operand.hbm [shape: f32[128,256], index: 3, kind: input, shape index: {}]   ;;  %s1789_s4 = inlined_call_operand.vmem [shape: f32[1,256], index: 4, kind: input, shape index: {}]   ;;  %s1790_s5 = inlined_call_operand.hbm [shape: f32[8,256], index: 5, kind: output, shape index: {0}]   ;;  %s1791_s6 = inlined_call_operand.hbm [shape: f32[8,128], index: 6, kind: output, shape index: {1}]   ;;  %s1792_s7 = inlined_call_operand.vmem [shape: f32[8,1], index: 7, kind: output, shape index: {2}]  }
   0x1   :  { %15 = vsyncpa [#allocation3 + $0x1], 0 }
   0x2   :  { %16 = vsyncpa [#allocation6], 0 }
   0x3   :  { %18 = vsyncpa [#allocation6 + $0x1], 0 }
   0x4   :  { %19 = vsyncpa [#allocation4], 0 }
   0x5   :  { %21 = vsyncpa [#allocation4 + $0x1], 0 }
   0x6   :  { %22 = vsyncpa [#allocation10], 0  ;;  %s1448_s24 = smov 0   ;;  %s1450_s25 = smov 0  }
   0x7   :  { %s1452_s26 = smov 0   ;;  %s1454_s27 = smov 0  }
   0x8   :  { %s1456_s28 = smov 0   ;;  %s1458_s29 = smov 0  }
   0x9   :  { %s1460_s30 = smov 0  }
   0xa LB: > { %s1482_s8 = sadd.s32 4294967295, %s1393_s30   ;;  %s37_s9 = sadd.s32 1, %s1389_s29  ;;  %s1393_s30 = sphi %s1460_s30, %s28_s30   ;;  %s1389_s29 = sphi %s1458_s29, %s1822_s29   ;;  %s1385_s28 = sphi %s1456_s28, %s1821_s28   ;;  %s1381_s27 = sphi %s1454_s27, %s1775_s27   ;;  %s1377_s26 = sphi %s1452_s26, %s1820_s26   ;;  %s1373_s25 = sphi %s1450_s25, %s1770_s25   ;;  %s1369_s24 = sphi %s1448_s24, %s1819_s24  }
   0xb   : > { %p38_p0 = scmp.ge.s32.totalorder %s37_s9, 2  ;;  %p1365_p1 = scmp.ne.s32.totalorder %s1381_s27, 0 }
   0xc   : > { %p1795_p2 = scmp.eq.s32.totalorder %s1393_s30, 0  ;;  %p66_p3 = scmp.ne.s32.totalorder %s1381_s27, %s1377_s26 }
   0xd   : > { %s1824_s9 = smov (%p38_p0, %s37_s9), 0  ;;  %p1794_p4 = scmp.eq.s32.totalorder %s1482_s8, 0 }
   0xe   : > { %1798 = sst [smem:[#allocation16_spill]] %s1824_s9  ;;  %p62_p5 = por %p1365_p1, %p1795_p2 }
   0xf   : > { %p1495_p6 = por %p1794_p4, %p66_p3  ;;  %p1793_p8 = scmp.lt.s32.totalorder %s1393_s30, 2 }
  0x10   : > { %s317_s11 = sand.u32 1, %s1393_s30   ;;  %s1395_s13 = smov [#allocation5]  }
  0x11   : > { %s1799_s10 = scalar_select %p1495_p6, 1, 0 }
  0x12   : > { %p1504_p9 = pnand %p1793_p8, %p62_p5  ;;  %s330_s14 = sshll.u32 %s1395_s13, 4  ;;  %s331_s14 = int_to_ptr.vmem [resolvable:$true] %s330_s14 }
  0x13   : > { %s1509_s15 = scalar_lea.sflag [#allocation6], %s317_s11  ;;  %s1175_s18 = scalar_lea.hbm %s1786_s1, 4096 }
  0x14   : > { %p1176_p11 = scmp.ne.s32.totalorder %s1786_s1, %s1175_s18  ;;  %p1177_p12 = pneg %p1504_p9 }
  0x15   : > { %p1182_p1 = scmp.lt.s32.totalorder %s1175_s18, %s1175_s18 }
  0x16   : > { %p1178_p13 = pnand %p1177_p12, %p1176_p11 }
  0x18   : > { %p1179_p0 = pneg %p1178_p13 }
  0x1a   : > { %p1184_p3 = pnand %p1182_p1, %p1179_p0 }
  0x1c   : > { %1187 = shalt.err (!%p1184_p3)
}
  0x1d   : > { %s1188_s21 = scalar_lea.vmem %s331_s14, 4096  ;;  %s1195_s22 = scalar_lea.vmem %s331_s14, 8192 }
  0x1e   : > { %p1189_p5 = scmp.ne.s32.totalorder %s331_s14, %s1188_s21  ;;  %p1196_p4 = scmp.lt.s32.totalorder %s331_s14, %s331_s14 }
  0x1f   : > { %p1197_p2 = scmp.lt.s32.totalorder %s1195_s22, %s1188_s21 }
  0x20   : > { %p1191_p7 = pnand %p1189_p5, %p1177_p12 }
  0x21   : > { %p1198_p10 = por %p1197_p2, %p1196_p4 }
  0x22   : > { %p1192_p8 = pneg %p1191_p7 }
  0x24   : > { %p1199_p6 = pnand %p1198_p10, %p1192_p8 }
  0x26   : > { %1202 = shalt.err (!%p1199_p6)
}
  0x27   : > { %s1396_s23 = smov 128   ;;  %s1397_s26 = smov 8  }
  0x28   : > { %1076 = dma.hbm_to_vmem [thread:$0]  (!%p1504_p9), %s1786_s1, 4096, %s331_s14, %s1509_s15, %s1396_s23, %s1396_s23, %s1397_s26  }
  0x29   : > { %p376_p11 = scmp.lt.s32.totalorder %s1393_s30, 3  ;;  %p1801_p7 = scmp.ge.s32.totalorder %s1393_s30, 1 }
  0x2a   : > { %s1398_s17 = smov [#allocation2]   ;;  %s1203_s21 = scalar_lea.hbm %s1785_s0, 256 }
  0x2b   : > { %p1534_p13 = pnand %p1801_p7, %p376_p11  ;;  %s310_s18 = sshll.u32 %s1398_s17, 4  ;;  %s311_s18 = int_to_ptr.vmem [resolvable:$true] %s310_s18 }
  0x2c   : > { %p1204_p2 = scmp.ne.s32.totalorder %s1785_s0, %s1203_s21  ;;  %p1210_p8 = scmp.lt.s32.totalorder %s1203_s21, %s1203_s21 }
  0x2d   : > { %s1802_s16 = scalar_select %p1534_p13, 1, 0 }
  0x2e   : > { %p1206_p4 = pnand %p1204_p2, %p1177_p12 }
  0x30   : > { %p1207_p6 = pneg %p1206_p4 }
  0x32   : > { %p1212_p10 = pnand %p1210_p8, %p1207_p6 }
  0x34   : > { %1215 = shalt.err (!%p1212_p10)
}
  0x35   : > { %s1216_s14 = scalar_lea.vmem %s311_s18, 256  ;;  %s1223_s23 = scalar_lea.vmem %s311_s18, 512 }
  0x36   : > { %p1217_p0 = scmp.ne.s32.totalorder %s311_s18, %s1216_s14  ;;  %p1224_p5 = scmp.lt.s32.totalorder %s311_s18, %s311_s18 }
  0x37   : > { %p1225_p11 = scmp.lt.s32.totalorder %s1223_s23, %s1216_s14 }
  0x38   : > { %p1219_p1 = pnand %p1217_p0, %p1177_p12 }
  0x39   : > { %p1226_p7 = por %p1225_p11, %p1224_p5 }
  0x3a   : > { %p1220_p3 = pneg %p1219_p1 }
  0x3c   : > { %p1227_p13 = pnand %p1226_p7, %p1220_p3 }
  0x3e   : > { %1230 = shalt.err (!%p1227_p13)
}
  0x3f   : > { %1073 = dma.hbm_to_vmem [thread:$0]  (!%p1504_p9), %s1785_s0, 256, %s311_s18, [#allocation3]  }
  0x40   : > { %s979_s11 = sadd.s32 4294967294, %s1393_s30   ;;  %p1366_p12 = scmp.ne.s32.totalorder %s1373_s25, 0 }
  0x41   : > { %p1803_p2 = scmp.eq.s32.totalorder %s1393_s30, 0  ;;  %p149_p13 = scmp.ne.s32.totalorder %s1373_s25, %s1369_s24 }
  0x42   : > { %p1797_p6 = scmp.eq.s32.totalorder %s1482_s8, 1  ;;  %p1804_p8 = scmp.eq.s32.totalorder %s1482_s8, 0 }
  0x43   : > { %p145_p4 = por %p1366_p12, %p1803_p2  ;;  %p219_p1 = scmp.eq.s32.totalorder %s979_s11, 1 }
  0x44   : > { %p1564_p10 = por %p149_p13, %p1804_p8  ;;  %p1570_p0 = por %p1366_p12, %p1797_p6 }
  0x45   : > { %p1574_p3 = por %p219_p1, %p149_p13  ;;  %s1399_s18 = smov [#allocation7]  }
  0x46   : > { %s354_s19 = sshll.u32 %s1399_s18, 4  ;;  %p1808_p9 = scmp.lt.s32.totalorder %s1393_s30, 2  ;;  %s355_s19 = int_to_ptr.vmem [resolvable:$true] %s354_s19 }
  0x47   : > { %s1807_s17 = scalar_select %p1574_p3, 1, 0 }
  0x48   : > { %p1580_p5 = pnand %p1808_p9, %p145_p4  ;;  %s1244_s21 = scalar_lea.vmem %s355_s19, 4096 }
  0x49   : > { %p1245_p7 = scmp.ne.s32.totalorder %s355_s19, %s1244_s21  ;;  %s1251_s22 = scalar_lea.vmem %s355_s19, 8192 }
  0x4a   : > { %p1233_p11 = pneg %p1580_p5  ;;  %p1252_p13 = scmp.lt.s32.totalorder %s355_s19, %s355_s19 }
  0x4b   : > { %p1253_p8 = scmp.lt.s32.totalorder %s1251_s22, %s1244_s21 }
  0x4c   : > { %p1247_p12 = pnand %p1245_p7, %p1233_p11 }
  0x4d   : > { %p1254_p1 = por %p1253_p8, %p1252_p13 }
  0x4e   : > { %p1248_p2 = pneg %p1247_p12 }
  0x50   : > { %p1255_p6 = pnand %p1254_p1, %p1248_p2 }
  0x52   : > { %1258 = shalt.err (!%p1255_p6)
}
  0x53   : > { %s1400_s14 = smov 256   ;;  %s1401_s23 = smov 16  }
  0x54   : > { %1079 = dma.hbm_to_vmem [thread:$0]  (!%p1580_p5), %s1788_s3, 4096, %s355_s19, %s1509_s15, %s1400_s14, %s1400_s14, %s1401_s23  }
  0x55   : > { %p1810_p4 = scmp.ne.s32.totalorder %s1802_s16, 0 }
  0x56   : > { %s382_s11 = sand.u32 (!%p1810_p4), 1, %s1381_s27   ;;  %p1811_p6 = scmp.ne.s32.totalorder (!%p1810_p4), %s1799_s10, 0 }
  0x57   : > { %380 = sbr.rel (%p1810_p4) target bundleno = 797 (0x31d), region = 40  ;;  %s999_s18 = sshll.u32 (!%p1810_p4), %s382_s11, 4 }
  0x58   : > { %s383_s21 = scalar_lea.sflag (!%p1810_p4), [#allocation3], %s382_s11  ;;  %s1595_s22 = scalar_lea.vmem (!%p1810_p4), [#allocation2], %s999_s18 }
  0x5c   : > { %1346 = dma.done.wait (%p1811_p6), %s383_s21, 256  }
  0x5d   : > { %1348 = vsyncadd (%p1811_p6), %s383_s21, 4294967040  ;;  %s391_s20 = sand.u32 1, %s1482_s8   ;;  %s1000_s9 = sshll.u32 %s382_s11, 8 }
  0x5e   : > { %s392_s15 = scalar_lea.sflag [#allocation6], %s391_s20  ;;  %s1602_s19 = scalar_lea.vmem [#allocation5], %s1000_s9 }
  0x5f   : > { %1350 = dma.done.wait (%p1811_p6), %s392_s15, 4096  }
  0x60   : > { %1352 = vsyncadd (%p1811_p6), %s392_s15, 4294963200  ;;  %s1609_s16 = sand.u32 1, %s1373_s25  }
  0x61   : > { %s1001_s14 = sshll.u32 %s1609_s16, 8 }
  0x62   : > { %s1612_s23 = scalar_lea.vmem [#allocation7], %s1001_s14 }
  0x63   : > { %1354 = dma.done.wait (%p1564_p10), %s392_s15, 4096  }
  0x64   : > { %1356 = vsyncadd (%p1564_p10), %s392_s15, 4294963200  ;;  %s1002_s26 = sshll.u32 %s1609_s16, 4  ;;  %s1003_s11 = sadd.s32 4294967295, %s1385_s28 }
  0x65   : > { %p467_p9 = scmp.gt.s32.totalorder %s1003_s11, 0  ;;  %s1629_s9 = scalar_lea.vmem [#allocation8], %s1002_s26 }
  0x66   : > { %p1005_p10 = scmp.ne.s32.totalorder %s1385_s28, 0 }
  0x67   : > { %s1826_s11 = smov (!%p467_p9, %s1003_s11), 0 }
  0x68   : > { %s1004_s10 = sshll.u32 %s1826_s11, 1  ;;  %488 = sbr.rel (%p1005_p10) target bundleno = 111 (0x6f), region = 56 }
  0x69   : > { %p470_p5 = scmp.lt.s32.totalorder %s1004_s10, 1 }
  0x6b   : > { %s1828_s10 = smov (!%p470_p5, %s1004_s10), 1 }
  0x6c   : > { %s472_s20 = scalar_lea.vmem %s1789_s4, %s1828_s10 }
  0x6d   : > { %vm490_vm0 = vcmask 7168   ;;  %v1402_v0 = vmov 0.0  }
  0x6e   : > { %489 = vst [vmem:[#allocation9] sm:$0xff] %v1402_v0  ;;  %491 = vst.msk [vmem:[%s1792_s7] sm:$0xff] %vm490_vm0, %v1402_v0 }
  0x6f PF: > { %p1006_p11 = scmp.ge.s32.totalorder %s1385_s28, 1 }
  0x71   : > { %495 = sbr.rel (%p1006_p11) target bundleno = 351 (0x15f), region = 60 }
  0x76   : > { %v539_v1 = vld [vmem:[%s1602_s19 + $0xf8] sm:$0xff]  ;;  %v538_v3 = vld [vmem:[%s1602_s19 + $0xf0] sm:$0xff]  ;;  %v537_v5 = vld [vmem:[%s1602_s19 + $0xe8] sm:$0xff]  ;;  %vm505_vm1 = vcmask 7168  }
  0x77   : > { %v523_v2 = vld [vmem:[%s1602_s19 + $0x78] sm:$0xff]  ;;  %1023 = vmatprep.subr.mxu0 %v539_v1  ;;  %v522_v4 = vld [vmem:[%s1602_s19 + $0x70] sm:$0xff]  ;;  %v521_v6 = vld [vmem:[%s1602_s19 + $0x68] sm:$0xff] }
  0x78   : > { %1024 = vmatpush3.msra.mxu0 %v523_v2  ;;  %v536_v7 = vld [vmem:[%s1602_s19 + $0xe0] sm:$0xff]  ;;  %v535_v9 = vld [vmem:[%s1602_s19 + $0xd8] sm:$0xff]  ;;  %v534_v11 = vld [vmem:[%s1602_s19 + $0xd0] sm:$0xff] }
  0x79   : > { %1025 = vmatprep.subr.mxu0 %v538_v3  ;;  %v520_v8 = vld [vmem:[%s1602_s19 + $0x60] sm:$0xff]  ;;  %v519_v10 = vld [vmem:[%s1602_s19 + $0x58] sm:$0xff]  ;;  %v518_v12 = vld [vmem:[%s1602_s19 + $0x50] sm:$0xff] }
  0x7a   : > { %1026 = vmatpush3.msra.mxu0 %v522_v4  ;;  %v533_v13 = vld [vmem:[%s1602_s19 + $0xc8] sm:$0xff]  ;;  %v496_v17 = vld [vmem:[%s1595_s22] sm:$0xff]  ;;  %v531_v21 = vld [vmem:[%s1602_s19 + $0xb8] sm:$0xff] }
  0x7b   : > { %1027 = vmatprep.subr.mxu0 %v537_v5  ;;  %v497_v14 = vld [vmem:[%s1595_s22 + $0x8] sm:$0xff]  ;;  %v532_v18 = vld [vmem:[%s1602_s19 + $0xc0] sm:$0xff]  ;;  %v499_v19 = vmul.f32 %v496_v17, %v496_v17  ;;  %v530_v24 = vld [vmem:[%s1602_s19 + $0xb0] sm:$0xff] }
  0x7c   : > { %1028 = vmatpush3.msra.mxu0 %v521_v6  ;;  %v517_v15 = vld [vmem:[%s1602_s19 + $0x48] sm:$0xff]  ;;  %v500_v16 = vmul.f32 %v497_v14, %v497_v14  ;;  %604 = vmatprep.mubr.f32.mxu0 %v497_v14  ;;  %v516_v20 = vld [vmem:[%s1602_s19 + $0x40] sm:$0xff]  ;;  %v515_v23 = vld [vmem:[%s1602_s19 + $0x38] sm:$0xff] }
  0x7d   : > { %1029 = vmatprep.subr.mxu0 %v536_v7  ;;  %v514_v25 = vld [vmem:[%s1602_s19 + $0x30] sm:$0xff]  ;;  %v529_v26 = vld [vmem:[%s1602_s19 + $0xa8] sm:$0xff]  ;;  %v528_v28 = vld [vmem:[%s1602_s19 + $0xa0] sm:$0xff] }
  0x7e   : > { %1030 = vmatpush3.msra.mxu0 %v520_v8  ;;  %v501_v22 = vadd.f32 %v500_v16, %v499_v19  ;;  %v513_v27 = vld [vmem:[%s1602_s19 + $0x28] sm:$0xff]  ;;  %v512_v29 = vld [vmem:[%s1602_s19 + $0x20] sm:$0xff]  ;;  %v527_v30 = vld [vmem:[%s1602_s19 + $0x98] sm:$0xff] }
  0x7f   : > { %1031 = vmatprep.subr.mxu0 %v535_v9  ;;  %v511_v31 = vld [vmem:[%s1602_s19 + $0x18] sm:$0xff]  ;;  %v526_v32 = vld [vmem:[%s1602_s19 + $0x90] sm:$0xff]  ;;  %v525_v34 = vld [vmem:[%s1602_s19 + $0x88] sm:$0xff] }
  0x80   : > { %1032 = vmatpush3.msra.mxu0 %v519_v10  ;;  %502 = vadd.xlane.f32.xlu0 %v501_v22  ;;  %v510_v33 = vld [vmem:[%s1602_s19 + $0x10] sm:$0xff]  ;;  %v509_v35 = vld [vmem:[%s1602_s19 + $0x8] sm:$0xff]  ;;  %v524_v36 = vld [vmem:[%s1602_s19 + $0x80] sm:$0xff] }
  0x81   : > { %1033 = vmatprep.subr.mxu0 %v534_v11  ;;  %v508_v37 = vld [vmem:[%s1602_s19] sm:$0xff] }
  0x82   : > { %1034 = vmatpush3.msra.mxu0 %v518_v12  ;;  %v498_v38 = vld [vmem:[%s1792_s7] sm:$0xff] }
  0x83   : > { %1035 = vmatprep.subr.mxu0 %v533_v13  ;;  %v507_v42 = vld [vmem:[#allocation9] sm:$0xff] }
  0x84   : > { %1036 = vmatpush3.msra.mxu0 %v517_v15 }
  0x85   : > { %1037 = vmatprep.subr.mxu0 %v532_v18 }
  0x86   : > { %1038 = vmatpush3.msra.mxu0 %v516_v20 }
  0x87   : > { %1039 = vmatprep.subr.mxu0 %v531_v21 }
  0x88   : > { %1040 = vmatpush3.msra.mxu0 %v515_v23 }
  0x89   : > { %1041 = vmatprep.subr.mxu0 %v530_v24 }
  0x8a   : > { %1042 = vmatpush3.msra.mxu0 %v514_v25 }
  0x8b   : > { %1043 = vmatprep.subr.mxu0 %v529_v26 }
  0x8c   : > { %1044 = vmatpush3.msra.mxu0 %v513_v27 }
  0x8d   : > { %1045 = vmatprep.subr.mxu0 %v528_v28 }
  0x8e   : > { %1046 = vmatpush3.msra.mxu0 %v512_v29 }
  0x8f   : > { %1047 = vmatprep.subr.mxu0 %v527_v30 }
  0x90   : > { %1048 = vmatpush3.msra.mxu0 %v511_v31 }
  0x91   : > { %1049 = vmatprep.subr.mxu0 %v526_v32 }
  0x92   : > { %1050 = vmatpush3.msra.mxu0 %v510_v33 }
  0x93   : > { %1051 = vmatprep.subr.mxu0 %v525_v34 }
  0x94   : > { %1052 = vmatpush3.msra.mxu0 %v509_v35 }
  0x95   : > { %1053 = vmatprep.subr.mxu0 %v524_v36 }
  0x96   : > { %1054 = vmatpush3.msra.mxu0 %v508_v37 }
  0x97   : > { %605 = vmatmul.mubr.f32.vlgmr.msra.gmra.mxu0 %v496_v17 }
 0x109   : > { %v503_v39 = vpop.xlane.xlu0 %502 }
 0x10a   : > { %v504_v40 = vadd.f32 %v503_v39, %v498_v38 }
 0x10c   : > { %506 = vst.msk [vmem:[%s1792_s7] sm:$0xff] %vm505_vm1, %v504_v40 }
 0x157   : > { %v1055_v41 = vpop.f32.mrf.mxu0 }
 0x159   : > { %v1056_v43 = vpop.f32.mrf.mxu0 }
 0x15a   : > { %v1057_v44 = vadd.f32 %v1056_v43, %v1055_v41 }
 0x15c   : > { %v610_v45 = vadd.f32 %v1057_v44, %v507_v42 }
 0x15e   : > { %611 = vst [vmem:[#allocation9] sm:$0xff] %v610_v45 }
 0x15f PF: > { %614 = sbr.rel (%p1005_p10) target bundleno = 516 (0x204), region = 64 }
 0x164   : > { %v615_v46 = vld [vmem:[%s1792_s7] sm:$0xff]  ;;  %v1403_v47 = vmov 0   ;;  %vm636_vm2 = vcmask 7168  }
 0x165   : > { %1169 = vset.pattern.permute.xlu0 %v1403_v47  ;;  %v616_v48 = vadd.f32 1e-24, %v615_v46  ;;  %v618_v51 = vld [vmem:[#allocation9] sm:$0xff] }
 0x166   : > { %v1008_v52 = vld [vmem:[%s1787_s2] ss:$0 sm:$0xff] }
 0x167   : > { %1170 = vrsqrt.f32 %v616_v48 }
 0x174   : > { %v1171_v49 = vpop.eup %1170 }
 0x175   : > { %621 = vperm.xlu0 %1169, %v1171_v49   ;;  %v635_v50 = vmul.f32 %v1171_v49, %v615_v46 }
 0x177   : > { %637 = vst.msk [vmem:[%s1792_s7] sm:$0xff] %vm636_vm2, %v635_v50 }
 0x1f0   : > { %v622_v53 = vpop.permute.xlu0 %621 }
 0x1f1   : > { %v624_v54 = vmul.f32 %v622_v53, %v618_v51 }
 0x1f3   : > { %v632_v55 = vadd.f32 %v1008_v52, %v624_v54 }
 0x1f5   : > { %1172 = vtanh.f32 %v632_v55 }
 0x202   : > { %v1173_v56 = vpop.eup %1172 }
 0x203   : > { %634 = vst [vmem:[#allocation9] sm:$0xff] %v1173_v56 }
 0x204 PF: > { %p1009_p7 = scmp.lt.s32.totalorder %s1385_s28, 1 }
 0x206   : > { %641 = sbr.rel (%p1009_p7) target bundleno = 756 (0x2f4), region = 68 }
 0x20b   : > { %v674_v57 = vld [vmem:[%s1612_s23 + $0xf8] sm:$0xff]  ;;  %v673_v58 = vld [vmem:[%s1612_s23 + $0xf0] sm:$0xff]  ;;  %v672_v59 = vld [vmem:[%s1612_s23 + $0xe8] sm:$0xff]  ;;  %v1404_v61 = vmov 0.0   ;;  %v1405_v63 = vmov 0   ;;  %v677_v29 = vlaneseq }
 0x20c   : > { %687 = vmatprep.subr.mxu0 %v674_v57  ;;  %v671_v60 = vld [vmem:[%s1612_s23 + $0xe0] sm:$0xff]  ;;  %751 = vmatprep.mubr.f32.mxu0 %v1404_v61  ;;  %v670_v62 = vld [vmem:[%s1612_s23 + $0xd8] sm:$0xff]  ;;  %v669_v0 = vld [vmem:[%s1612_s23 + $0xd0] sm:$0xff] }
 0x20d   : > { %688 = vmatpush1.msra.mxu0 %v673_v58  ;;  %1174 = vset.pattern.permute.xlu0 %v1405_v63  ;;  %v668_v1 = vld [vmem:[%s1612_s23 + $0xc8] sm:$0xff]  ;;  %v667_v2 = vld [vmem:[%s1612_s23 + $0xc0] sm:$0xff]  ;;  %v666_v3 = vld [vmem:[%s1612_s23 + $0xb8] sm:$0xff]  ;;  %v678_v30 = vshrl.u32 %v677_v29, 7 }
 0x20e   : > { %689 = vmatprep.subr.mxu0 %v672_v59  ;;  %v665_v4 = vld [vmem:[%s1612_s23 + $0xb0] sm:$0xff]  ;;  %v664_v5 = vld [vmem:[%s1612_s23 + $0xa8] sm:$0xff]  ;;  %v663_v6 = vld [vmem:[%s1612_s23 + $0xa0] sm:$0xff] }
 0x20f   : > { %690 = vmatpush1.msra.mxu0 %v671_v60  ;;  %v662_v7 = vld [vmem:[%s1612_s23 + $0x98] sm:$0xff]  ;;  %v661_v8 = vld [vmem:[%s1612_s23 + $0x90] sm:$0xff]  ;;  %v758_v9 = vld [vmem:[%s1792_s7] sm:$0xff]  ;;  %v679_v31 = vsub.s32 0, %v678_v30  ;;  %v683_v33 = vsub.s32 1, %v678_v30 }
 0x210   : > { %691 = vmatprep.subr.mxu0 %v670_v62  ;;  %v660_v10 = vld [vmem:[%s1612_s23 + $0x88] sm:$0xff]  ;;  %761 = vperm.xlu0 %1174, %v758_v9   ;;  %v659_v11 = vld [vmem:[%s1612_s23 + $0x80] sm:$0xff]  ;;  %v658_v12 = vld [vmem:[%s1612_s23 + $0x78] sm:$0xff] }
 0x211   : > { %692 = vmatpush1.msra.mxu0 %v669_v0  ;;  %v657_v13 = vld [vmem:[%s1612_s23 + $0x70] sm:$0xff]  ;;  %v656_v14 = vld [vmem:[%s1612_s23 + $0x68] sm:$0xff]  ;;  %v655_v15 = vld [vmem:[%s1612_s23 + $0x60] sm:$0xff] }
 0x212   : > { %693 = vmatprep.subr.mxu0 %v668_v1  ;;  %v654_v16 = vld [vmem:[%s1612_s23 + $0x58] sm:$0xff]  ;;  %v653_v17 = vld [vmem:[%s1612_s23 + $0x50] sm:$0xff]  ;;  %v652_v18 = vld [vmem:[%s1612_s23 + $0x48] sm:$0xff] }
 0x213   : > { %694 = vmatpush1.msra.mxu0 %v667_v2  ;;  %v651_v19 = vld [vmem:[%s1612_s23 + $0x40] sm:$0xff]  ;;  %v650_v20 = vld [vmem:[%s1612_s23 + $0x38] sm:$0xff]  ;;  %v649_v21 = vld [vmem:[%s1612_s23 + $0x30] sm:$0xff] }
 0x214   : > { %695 = vmatprep.subr.mxu0 %v666_v3  ;;  %v648_v22 = vld [vmem:[%s1612_s23 + $0x28] sm:$0xff]  ;;  %v647_v23 = vld [vmem:[%s1612_s23 + $0x20] sm:$0xff]  ;;  %v646_v24 = vld [vmem:[%s1612_s23 + $0x18] sm:$0xff] }
 0x215   : > { %696 = vmatpush1.msra.mxu0 %v665_v4  ;;  %v645_v25 = vld [vmem:[%s1612_s23 + $0x10] sm:$0xff]  ;;  %v644_v26 = vld [vmem:[%s1612_s23 + $0x8] sm:$0xff]  ;;  %v643_v27 = vld [vmem:[%s1612_s23] sm:$0xff] }
 0x216   : > { %697 = vmatprep.subr.mxu0 %v664_v5  ;;  %v642_v28 = vld [vmem:[#allocation9] sm:$0xff] }
 0x217   : > { %698 = vmatpush1.msra.mxu0 %v663_v6  ;;  %v675_v32 = vld [vmem:[%s472_s20] sm:$0x3] }
 0x218   : > { %699 = vmatprep.subr.mxu0 %v662_v7  ;;  %v680_v34 = vrot.slane %v675_v32, %v679_v31  ;;  %v684_v35 = vrot.slane %v675_v32, %v683_v33 }
 0x219   : > { %700 = vmatpush1.msra.mxu0 %v661_v8 }
 0x21a   : > { %701 = vmatprep.subr.mxu0 %v660_v10 }
 0x21b   : > { %702 = vmatpush1.msra.mxu0 %v659_v11 }
 0x21c   : > { %703 = vmatprep.subr.mxu0 %v658_v12 }
 0x21d   : > { %704 = vmatpush1.msra.mxu0 %v657_v13 }
 0x21e   : > { %705 = vmatprep.subr.mxu0 %v656_v14 }
 0x21f   : > { %706 = vmatpush1.msra.mxu0 %v655_v15 }
 0x220   : > { %707 = vmatprep.subr.mxu0 %v654_v16 }
 0x221   : > { %708 = vmatpush1.msra.mxu0 %v653_v17 }
 0x222   : > { %709 = vmatprep.subr.mxu0 %v652_v18 }
 0x223   : > { %710 = vmatpush1.msra.mxu0 %v651_v19 }
 0x224   : > { %711 = vmatprep.subr.mxu0 %v650_v20 }
 0x225   : > { %712 = vmatpush1.msra.mxu0 %v649_v21 }
 0x226   : > { %713 = vmatprep.subr.mxu0 %v648_v22 }
 0x227   : > { %714 = vmatpush1.msra.mxu0 %v647_v23 }
 0x228   : > { %715 = vmatprep.subr.mxu0 %v646_v24 }
 0x229   : > { %716 = vmatpush1.msra.mxu0 %v645_v25 }
 0x22a   : > { %717 = vmatprep.subr.mxu0 %v644_v26 }
 0x22b   : > { %718 = vmatpush1.msra.mxu0 %v643_v27 }
 0x22c   : > { %752 = vmatmul.mubr.f32.vlgmr.msra.gmra.mxu0 %v642_v28 }
 0x28b   : > { %v762_v37 = vpop.permute.xlu0 %761 }
 0x2ec   : > { %v753_v36 = vpop.f32.mrf.mxu0 }
 0x2ed   : > { %v754_v38 = vadd.f32 %v753_v36, %v680_v34 }
 0x2ee   : > { %v755_v39 = vpop.f32.mrf.mxu0 }
 0x2ef   : > { %v764_v40 = vmul.f32 %v762_v37, %v754_v38  ;;  %v756_v41 = vadd.f32 %v755_v39, %v684_v35 }
 0x2f1   : > { %766 = vst [vmem:[%s1629_s9] sm:$0xff] %v764_v40  ;;  %v765_v42 = vmul.f32 %v762_v37, %v756_v41 }
 0x2f3   : > { %767 = vst [vmem:[%s1629_s9 + $0x8] sm:$0xff] %v765_v42 }
 0x2f4 PF: > { %s1022_s23 = sshll.u32 %s1826_s11, 8  ;;  %s792_s12 = sshll.u32 %s1629_s9, 4  ;;  %s793_s12 = int_to_ptr.vmem [resolvable:$true] %s792_s12 }
 0x2f5   : > { %s790_s21 = scalar_lea.hbm %s1790_s5, %s1022_s23  ;;  %s769_s15 = scalar_lea.sflag [#allocation4], %s1609_s16 }
 0x2f6   : > { %s1259_s22 = scalar_lea.vmem %s793_s12, 256  ;;  %s1406_s14 = smov [#allocation8]  }
 0x2f7   : > { %p1260_p12 = scmp.ne.s32.totalorder %s793_s12, %s1259_s22  ;;  %s1263_s28 = sshll.u32 %s1406_s14, 4  ;;  %s1264_s28 = int_to_ptr.vmem [resolvable:$false] %s1263_s28 }
 0x2f8   : > { %s1265_s26 = scalar_lea.vmem %s1264_s28, 512  ;;  %p1266_p8 = scmp.lt.s32.totalorder %s793_s12, %s1264_s28 }
 0x2f9   : > { %p1261_p2 = pnand %p1260_p12, %p1570_p0  ;;  %p1267_p1 = scmp.lt.s32.totalorder %s1265_s26, %s1259_s22 }
 0x2fb   : > { %p1262_p13 = pneg %p1261_p2  ;;  %p1268_p4 = por %p1267_p1, %p1266_p8 }
 0x2fd   : > { %p1269_p6 = pnand %p1268_p4, %p1262_p13 }
 0x2ff   : > { %1272 = shalt.err (!%p1269_p6)
}
 0x300   : > { %s1273_s11 = scalar_lea.hbm %s790_s21, 256  ;;  %s1277_s18 = scalar_lea.hbm %s1790_s5, 256 }
 0x301   : > { %p1274_p9 = scmp.ne.s32.totalorder %s790_s21, %s1273_s11  ;;  %p1278_p11 = scmp.lt.s32.totalorder %s790_s21, %s1790_s5 }
 0x302   : > { %p1279_p7 = scmp.lt.s32.totalorder %s1277_s18, %s1273_s11 }
 0x303   : > { %p1275_p5 = pnand %p1274_p9, %p1570_p0 }
 0x304   : > { %p1280_p12 = por %p1279_p7, %p1278_p11 }
 0x305   : > { %p1276_p10 = pneg %p1275_p5 }
 0x307   : > { %p1281_p2 = pnand %p1280_p12, %p1276_p10 }
 0x309   : > { %1284 = shalt.err (!%p1281_p2)
}
 0x30a   : > { %1064 = dma.vmem_to_hbm [thread:$0]  (%p1570_p0), %s793_s12, 256, %s790_s21, %s769_s15  }
 0x30b   : > { %s1407_s10 = smov [#allocation9]   ;;  %p1812_p8 = scmp.eq.s32.totalorder %s1482_s8, 1 }
 0x30c   : > { %s805_s20 = sshll.u32 %s1407_s10, 4  ;;  %s806_s20 = int_to_ptr.vmem [resolvable:$true] %s805_s20 }
 0x30d   : > { %s1285_s22 = scalar_lea.vmem %s806_s20, 128  ;;  %p1292_p6 = scmp.lt.s32.totalorder %s806_s20, %s806_s20 }
 0x30e   : > { %p1286_p13 = scmp.ne.s32.totalorder %s806_s20, %s1285_s22  ;;  %p1293_p9 = scmp.lt.s32.totalorder %s1285_s22, %s1285_s22 }
 0x310   : > { %p1287_p1 = pnand %p1286_p13, %p1812_p8  ;;  %p1294_p5 = por %p1293_p9, %p1292_p6 }
 0x312   : > { %p1288_p4 = pneg %p1287_p1 }
 0x314   : > { %p1295_p3 = pnand %p1294_p5, %p1288_p4 }
 0x316   : > { %1298 = shalt.err (!%p1295_p3)
}
 0x317   : > { %p1813_p10 = pmov %p1812_p8  ;;  %p1814_p0 = pmov %p1812_p8 }
 0x319   : > { %1066 = dma.vmem_to_hbm [thread:$0]  (%p1813_p10), %s806_s20, 128, %s1791_s6, [#allocation10]  }
 0x31a   : > { %1358 = dma.done.wait (%p1814_p0), [#allocation10], 128   ;;  %p1815_p11 = pmov %p1814_p0 }
 0x31c   : > { %1360 = vsyncadd (%p1815_p11), [#allocation10], 4294967168 }
 0x31d PF: > { %s831_s13 = sand.u32 1, %s1369_s24   ;;  %p1816_p7 = scmp.ne.s32.totalorder %s1807_s17, 0 }
 0x31e   : > { %p1817_p12 = scmp.ge.s32.totalorder %s1393_s30, 2  ;;  %s832_s21 = scalar_lea.sflag [#allocation4], %s831_s13 }
 0x320   : > { %p1081_p3 = pnand %p1817_p12, %p1816_p7 }
 0x322   : > { %p1082_p2 = pneg %p1081_p3 }
 0x324   : > { %1362 = dma.done.wait (%p1082_p2), %s832_s21, 256  }
 0x325   : > { %1364 = vsyncadd (%p1082_p2), %s832_s21, 4294967040  ;;  %s28_s30 = sadd.s32 1, %s1393_s30   ;;  %s1818_s8 = sld [smem:[#allocation16_spill]] }
 0x326   : > { %p25_p13 = scmp.ge.s32.totalorder %s28_s30, 4   ;;  %s1819_s24 = smov %s1373_s25 }
 0x327   : > { %s1770_s25 = smov 0   ;;  %s1820_s26 = smov %s1381_s27 }
 0x328   : > { %s1775_s27 = smov 0   ;;  %s1821_s28 = smov %s1389_s29 }
 0x329   :  { %27 = sbr.rel (!%p25_p13) target bundleno = 10 (0xa), region = 149 }
 0x32b   : > { %s1822_s29 = smov %s1818_s8 }
 0x32e   :  { %837 = vsyncpa [#allocation3], 1 }
 0x32f   :  { %839 = vsyncpa [#allocation3 + $0x1], 1 }
 0x330   :  { %840 = vsyncpa [#allocation6], 1 }
 0x331   :  { %842 = vsyncpa [#allocation6 + $0x1], 1 }
 0x332   :  { %843 = vsyncpa [#allocation4], 1 }
 0x333   :  { %845 = vsyncpa [#allocation4 + $0x1], 1 }
 0x334   :  { %846 = vsyncpa [#allocation10], 1 }

</bundles_post_ra>
